<compile_context>
chip_gen: v5e
topology: v5e:2x2
jax: 0.10.0
libtpu: 0.0.40
codegen_flags: <defaults>
</compile_context>

<pallas_src>
import jax
import jax.numpy as jnp
from jax import lax
from jax.experimental import pallas as pl
from jax.experimental.pallas import tpu as pltpu


def _round_up(x, m):
    return ((x + m - 1) // m) * m


def _cdiv(a, b):
    return -(-a // b)


def _mlp_kernel(z_ref, w1_ref, b1_ref, w2_ref, b2_ref, w3_ref, b3_ref, o_ref):
    # z_ref : (TB, Lp) bf16   -- natural layout, no wrapper transpose
    # w1_ref: (Hp, Lp) bf16, b1_ref: (Hp, 1) f32
    # w2_ref: (Hp, Hp) bf16, b2_ref: (Hp, 1) f32
    # w3_ref: (Hp, 1) f32,   b3_ref: (1,) f32 in SMEM
    # o_ref : (1, TB) f32    -- lane-dense output row

    # Layer 1: contract dim 1 of W1 (Hp, Lp) with dim 1 of z (TB, Lp)
    # -> (Hp, TB).  The in-kernel transpose rides the XLU slot; batch stays
    # on lanes the whole way so no wrapper-side z^T materialization is needed.
    h = lax.dot_general(
        w1_ref[...], z_ref[...],
        dimension_numbers=(((1,), (1,)), ((), ())),
        preferred_element_type=jnp.float32,
    )
    h = h + b1_ref[...]
    h = jnp.where(h > 0, h, 0.2 * h)

    # Layer 2: (Hp, Hp) @ (Hp, TB) -> (Hp, TB)
    h = jnp.dot(w2_ref[...], h.astype(jnp.bfloat16),
                preferred_element_type=jnp.float32)
    h = h + b2_ref[...]
    h = jnp.where(h > 0, h, 0.2 * h)

    # Layer 3 (out_features == 1): VPU multiply + sublane reduction instead of
    # an N=1 MXU matmul.  Result stays lane-dense: (1, TB).
    logits = jnp.sum(h * w3_ref[...], axis=0, keepdims=True) + b3_ref[0]
    o_ref[...] = jax.nn.sigmoid(logits).astype(o_ref.dtype)


def _pick_block_b(B, Hp, Lp, requested):
    """Pick the batch tile (always a multiple of 128 lanes)."""
    if B <= 256:
        # single lane-dense tile; padding batch to 128 is essentially free
        return _round_up(B, 128)
    # VMEM budget per batch lane: zt double buffer (bf16) + ~3 f32 (Hp, TB)
    # intermediates the compiler will materialize.  Cap so it stays ~<=24 MiB
    # (safe on v7x's 64 MiB physical VMEM with weights + headroom).
    per_lane = 2 * (2 * Lp) + 3 * (4 * Hp) + 8
    cap = max(128, (24 * 1024 * 1024 // per_lane) // 128 * 128)
    tb = min(_round_up(requested, 128), cap)
    # Keep at least 2 tiles so the "parallel" batch axis can shard across the
    # two TensorCores on v7x (neutral on v5e/v6e).
    tb = min(tb, _round_up(_cdiv(B, 2), 128))
    return max(128, tb)


def latent_discriminator(z, params, *, block_b=2048):
    """Forward pass of LatentDiscriminator.

    z:      (B, latent_dim) float32
    params: output of prepare_params() (minimally padded / bf16 kernel layout)
    returns (B, 1) float32 in (0, 1)
    """
    B, L = z.shape
    Hp, Lp = params["w1"].shape
    assert L <= Lp, "latent_dim larger than padded weights"

    block_b = _pick_block_b(B, Hp, Lp, block_b)
    B_pad = _round_up(B, block_b)
    num_tiles = B_pad // block_b

    # Stream z in its natural (B, L) layout (no transpose).  Pad only when the
    # shapes require it; otherwise the only wrapper op is the bf16 cast.
    if B_pad != B or Lp != L:
        z_in = jnp.zeros((B_pad, Lp), jnp.bfloat16).at[:B, :L].set(
            z.astype(jnp.bfloat16))
    else:
        z_in = z.astype(jnp.bfloat16)

    out = pl.pallas_call(
        _mlp_kernel,
        out_shape=jax.ShapeDtypeStruct((1, B_pad), jnp.float32),
        grid=(num_tiles,),
        in_specs=[
            pl.BlockSpec((block_b, Lp), lambda i: (i, 0)),      # z batch tile
            pl.BlockSpec((Hp, Lp), lambda i: (0, 0)),           # W1 (resident)
            pl.BlockSpec((Hp, 1), lambda i: (0, 0)),            # b1
            pl.BlockSpec((Hp, Hp), lambda i: (0, 0)),           # W2 (resident)
            pl.BlockSpec((Hp, 1), lambda i: (0, 0)),            # b2
            pl.BlockSpec((Hp, 1), lambda i: (0, 0)),            # W3 column
            pl.BlockSpec(memory_space=pltpu.MemorySpace.SMEM),  # b3 scalar
        ],
        out_specs=pl.BlockSpec((1, block_b), lambda i: (0, i)),
        compiler_params=pltpu.CompilerParams(
            dimension_semantics=("parallel",),
            vmem_limit_bytes=48 * 1024 * 1024,
        ),
    )(
        z_in,
        params["w1"], params["b1"],
        params["w2"], params["b2"],
        params["w3"], params["b3"],
    )

    # (1, B_pad) lane-dense row -> (B, 1): free layout plumbing in the wrapper.
    return out.reshape(B_pad, 1)[:B]


def prepare_params(raw):
    """Convert PyTorch-layout params into the minimally padded kernel layout.

    raw (PyTorch nn.Linear layout):
      w1 (H, L), b1 (H,), w2 (H, H), b2 (H,), w3 (1, H), b3 (1,)
    L is padded to a multiple of 16 (bf16 pack), H to a multiple of 8
    (sublane).  Padding is exact: padded rows stay zero through bias +
    LeakyReLU and contribute nothing to the final dot.
    """
    H, L = raw["w1"].shape
    Hp = _round_up(H, 8)
    Lp = _round_up(L, 16)

    def pad2(a, shape):
        out = jnp.zeros(shape, a.dtype)
        return out.at[: a.shape[0], : a.shape[1]].set(a)

    return {
        "w1": pad2(raw["w1"], (Hp, Lp)).astype(jnp.bfloat16),
        "b1": pad2(raw["b1"][:, None], (Hp, 1)).astype(jnp.float32),
        "w2": pad2(raw["w2"], (Hp, Hp)).astype(jnp.bfloat16),
        "b2": pad2(raw["b2"][:, None], (Hp, 1)).astype(jnp.float32),
        "w3": pad2(raw["w3"].T, (Hp, 1)).astype(jnp.float32),
        "b3": raw["b3"].astype(jnp.float32).reshape((1,)),
    }


def init_raw_params(key, latent_dim, hidden_dim):
    """Deterministic synthetic init matching nn.Linear defaults (PyTorch layout)."""
    ks = jax.random.split(key, 6)

    def uinit(k, fan_in, shape):
        bound = fan_in ** -0.5
        return jax.random.uniform(k, shape, jnp.float32, -bound, bound)

    return {
        "w1": uinit(ks[0], latent_dim, (hidden_dim, latent_dim)),
        "b1": uinit(ks[1], latent_dim, (hidden_dim,)),
        "w2": uinit(ks[2], hidden_dim, (hidden_dim, hidden_dim)),
        "b2": uinit(ks[3], hidden_dim, (hidden_dim,)),
        "w3": uinit(ks[4], hidden_dim, (1, hidden_dim)),
        "b3": uinit(ks[5], hidden_dim, (1,)),
    }


def reference_forward(z, raw):
    """Pure-JAX f32 reference matching the PyTorch module semantics."""
    h = z @ raw["w1"].T + raw["b1"]
    h = jnp.where(h > 0, h, 0.2 * h)
    h = h @ raw["w2"].T + raw["b2"]
    h = jnp.where(h > 0, h, 0.2 * h)
    return jax.nn.sigmoid(h @ raw["w3"].T + raw["b3"])


if __name__ == "__main__":
    latent_dim = 32
    hidden_dim = 64

    key = jax.random.PRNGKey(0)
    k_params, k_z1, k_z2 = jax.random.split(key, 3)

    raw = init_raw_params(k_params, latent_dim, hidden_dim)
    params = prepare_params(raw)

    # Small-batch path (single 128-lane tile, padded batch).
    batch = 16
    z = jax.random.normal(k_z1, (batch, latent_dim), dtype=jnp.float32)
    out = jax.block_until_ready(latent_discriminator(z, params))
    ref = reference_forward(z, raw)
    assert out.shape == (batch, 1)
    assert bool(jnp.all((out > 0.0) & (out < 1.0)))
    # bf16 matmul operands -> loosened tolerance vs the f32 reference
    assert jnp.allclose(out, ref, atol=2e-2, rtol=2e-2), (
        f"small-batch mismatch, max abs err = "
        f"{float(jnp.max(jnp.abs(out - ref))):.4e}"
    )

    # Multi-tile path (exercises >=2 parallel tiles + batch padding).
    batch2 = 384
    z2 = jax.random.normal(k_z2, (batch2, latent_dim), dtype=jnp.float32)
    out2 = jax.block_until_ready(latent_discriminator(z2, params))
    ref2 = reference_forward(z2, raw)
    assert out2.shape == (batch2, 1)
    assert bool(jnp.all((out2 > 0.0) & (out2 < 1.0)))
    assert jnp.allclose(out2, ref2, atol=2e-2, rtol=2e-2), (
        f"multi-tile mismatch, max abs err = "
        f"{float(jnp.max(jnp.abs(out2 - ref2))):.4e}"
    )

    print("KERNEL_OK")
</pallas_src>

<mosaic_0001>
module attributes {stable_mosaic.version = 11 : i64} {
  func.func @_mlp_kernel(%arg0: i32, %arg1: memref<128x32xbf16, #tpu.memory_space<vmem>>, %arg2: memref<64x32xbf16, #tpu.memory_space<vmem>>, %arg3: memref<64x1xf32, #tpu.memory_space<vmem>>, %arg4: memref<64x64xbf16, #tpu.memory_space<vmem>>, %arg5: memref<64x1xf32, #tpu.memory_space<vmem>>, %arg6: memref<64x1xf32, #tpu.memory_space<vmem>>, %arg7: memref<1xf32, #tpu.memory_space<smem>>, %arg8: memref<1x128xf32, #tpu.memory_space<vmem>>) attributes {dimension_semantics = [#tpu.dimension_semantics<parallel>], iteration_bounds = array<i64: 1>, scalar_prefetch = 0 : i64, scratch_operands = 0 : i64, tpu.core_type = #tpu.core_type<tc>, window_params = [{transform_indices = @transform_0, window_bounds = array<i64: 128, 32>}, {pipeline_mode = #tpu.pipeline_mode<synchronous>, transform_indices = @transform_1, window_bounds = array<i64: 64, 32>}, {pipeline_mode = #tpu.pipeline_mode<synchronous>, transform_indices = @transform_2, window_bounds = array<i64: 64, 1>}, {pipeline_mode = #tpu.pipeline_mode<synchronous>, transform_indices = @transform_3, window_bounds = array<i64: 64, 64>}, {pipeline_mode = #tpu.pipeline_mode<synchronous>, transform_indices = @transform_4, window_bounds = array<i64: 64, 1>}, {pipeline_mode = #tpu.pipeline_mode<synchronous>, transform_indices = @transform_5, window_bounds = array<i64: 64, 1>}, {transform_indices = @transform_6, window_bounds = array<i64: 1>}, {transform_indices = @transform_7, window_bounds = array<i64: 1, 128>}]} {
    %c0 = arith.constant 0 : index
    %c0_0 = arith.constant 0 : index
    %0 = vector.load %arg2[%c0, %c0_0] : memref<64x32xbf16, #tpu.memory_space<vmem>>, vector<64x32xbf16>
    %c0_1 = arith.constant 0 : index
    %c0_2 = arith.constant 0 : index
    %1 = vector.load %arg1[%c0_1, %c0_2] : memref<128x32xbf16, #tpu.memory_space<vmem>>, vector<128x32xbf16>
    %cst = arith.constant dense<0.000000e+00> : vector<64x128xf32>
    %2 = tpu.matmul %0, %1, %cst {dimension_numbers = #tpu.dot_dimension_numbers<[1], [1], [0], [0], [0, 0, 1, 0], [], []>} : vector<64x32xbf16>, vector<128x32xbf16>, vector<64x128xf32> -> vector<64x128xf32>
    %c0_3 = arith.constant 0 : index
    %c0_4 = arith.constant 0 : index
    %3 = vector.load %arg3[%c0_3, %c0_4] : memref<64x1xf32, #tpu.memory_space<vmem>>, vector<64x1xf32>
    %4 = vector.broadcast %3 : vector<64x1xf32> to vector<64x128xf32>
    %5 = arith.addf %2, %4 : vector<64x128xf32>
    %cst_5 = arith.constant 0.000000e+00 : f32
    %6 = vector.broadcast %cst_5 : f32 to vector<64x128xf32>
    %7 = arith.cmpf ogt, %5, %6 : vector<64x128xf32>
    %cst_6 = arith.constant 2.000000e-01 : f32
    %8 = vector.broadcast %cst_6 : f32 to vector<64x128xf32>
    %9 = arith.mulf %8, %5 : vector<64x128xf32>
    %10 = arith.select %7, %5, %9 : vector<64x128xi1>, vector<64x128xf32>
    %c0_7 = arith.constant 0 : index
    %c0_8 = arith.constant 0 : index
    %11 = vector.load %arg4[%c0_7, %c0_8] : memref<64x64xbf16, #tpu.memory_space<vmem>>, vector<64x64xbf16>
    %12 = arith.truncf %10 : vector<64x128xf32> to vector<64x128xbf16>
    %cst_9 = arith.constant dense<0.000000e+00> : vector<64x128xf32>
    %13 = tpu.matmul %11, %12, %cst_9 {dimension_numbers = #tpu.dot_dimension_numbers<[1], [0], [0], [1], [0, 0, 1, 1], [], []>} : vector<64x64xbf16>, vector<64x128xbf16>, vector<64x128xf32> -> vector<64x128xf32>
    %c0_10 = arith.constant 0 : index
    %c0_11 = arith.constant 0 : index
    %14 = vector.load %arg5[%c0_10, %c0_11] : memref<64x1xf32, #tpu.memory_space<vmem>>, vector<64x1xf32>
    %15 = vector.broadcast %14 : vector<64x1xf32> to vector<64x128xf32>
    %16 = arith.addf %13, %15 : vector<64x128xf32>
    %cst_12 = arith.constant 0.000000e+00 : f32
    %17 = vector.broadcast %cst_12 : f32 to vector<64x128xf32>
    %18 = arith.cmpf ogt, %16, %17 : vector<64x128xf32>
    %cst_13 = arith.constant 2.000000e-01 : f32
    %19 = vector.broadcast %cst_13 : f32 to vector<64x128xf32>
    %20 = arith.mulf %19, %16 : vector<64x128xf32>
    %21 = arith.select %18, %16, %20 : vector<64x128xi1>, vector<64x128xf32>
    %c0_14 = arith.constant 0 : index
    %c0_15 = arith.constant 0 : index
    %22 = vector.load %arg6[%c0_14, %c0_15] : memref<64x1xf32, #tpu.memory_space<vmem>>, vector<64x1xf32>
    %23 = vector.broadcast %22 : vector<64x1xf32> to vector<64x128xf32>
    %24 = arith.mulf %21, %23 : vector<64x128xf32>
    %cst_16 = arith.constant dense<0.000000e+00> : vector<128xf32>
    %25 = vector.multi_reduction <add>, %24, %cst_16 [0] : vector<64x128xf32> to vector<128xf32>
    %26 = vector.shape_cast %25 : vector<128xf32> to vector<1x128xf32>
    %c0_17 = arith.constant 0 : index
    %27 = memref.load %arg7[%c0_17] : memref<1xf32, #tpu.memory_space<smem>>
    %28 = vector.broadcast %27 : f32 to vector<1x128xf32>
    %29 = arith.addf %26, %28 : vector<1x128xf32>
    %30 = arith.negf %29 : vector<1x128xf32>
    %31 = math.exp %30 : vector<1x128xf32>
    %cst_18 = arith.constant 1.000000e+00 : f32
    %32 = vector.broadcast %cst_18 : f32 to vector<1x128xf32>
    %33 = arith.addf %32, %31 : vector<1x128xf32>
    %34 = arith.divf %32, %33 : vector<1x128xf32>
    %c0_19 = arith.constant 0 : index
    %c0_20 = arith.constant 0 : index
    %35 = vector.load %arg8[%c0_19, %c0_20] : memref<1x128xf32, #tpu.memory_space<vmem>>, vector<1x128xf32>
    tpu.vector_store %arg8[%c0_19, %c0_20], %34 {strides = array<i32>} : memref<1x128xf32, #tpu.memory_space<vmem>>, vector<1x128xf32>,
    return
  }
  func.func @transform_0(%arg0: i32) -> (i32, i32) {
    %c0_i32 = arith.constant 0 : i32
    %c0_i32_0 = arith.constant 0 : i32
    return %arg0, %c0_i32 : i32, i32
  }
  func.func @transform_1(%arg0: i32) -> (i32, i32) {
    %c0_i32 = arith.constant 0 : i32
    %c0_i32_0 = arith.constant 0 : i32
    %c0_i32_1 = arith.constant 0 : i32
    return %c0_i32, %c0_i32_0 : i32, i32
  }
  func.func @transform_2(%arg0: i32) -> (i32, i32) {
    %c0_i32 = arith.constant 0 : i32
    %c0_i32_0 = arith.constant 0 : i32
    %c0_i32_1 = arith.constant 0 : i32
    return %c0_i32, %c0_i32_0 : i32, i32
  }
  func.func @transform_3(%arg0: i32) -> (i32, i32) {
    %c0_i32 = arith.constant 0 : i32
    %c0_i32_0 = arith.constant 0 : i32
    %c0_i32_1 = arith.constant 0 : i32
    return %c0_i32, %c0_i32_0 : i32, i32
  }
  func.func @transform_4(%arg0: i32) -> (i32, i32) {
    %c0_i32 = arith.constant 0 : i32
    %c0_i32_0 = arith.constant 0 : i32
    %c0_i32_1 = arith.constant 0 : i32
    return %c0_i32, %c0_i32_0 : i32, i32
  }
  func.func @transform_5(%arg0: i32) -> (i32, i32) {
    %c0_i32 = arith.constant 0 : i32
    %c0_i32_0 = arith.constant 0 : i32
    %c0_i32_1 = arith.constant 0 : i32
    return %c0_i32, %c0_i32_0 : i32, i32
  }
  func.func @transform_6(%arg0: i32) -> i32 {
    %c0_i32 = arith.constant 0 : i32
    %c0_i32_0 = arith.constant 0 : i32
    return %c0_i32 : i32
  }
  func.func @transform_7(%arg0: i32) -> (i32, i32) {
    %c0_i32 = arith.constant 0 : i32
    %c0_i32_0 = arith.constant 0 : i32
    return %c0_i32, %arg0 : i32, i32
  }
}

</mosaic_0001>

<bundles_post_ra>
// kernel: tpu_custom_call.1
= control target key start
LH: loop header
LB: loop body
LE: loop exit
PB: predicated region body
PF: predicated region fallthrough
CT: control target
= control target key end

     0   :  { %vm161_vm0 = vcmask 261120   ;;  %s825_s0 = inlined_call_operand.vmem [shape: bf16[128,32], index: 0, kind: input, shape index: {}]   ;;  %s826_s1 = inlined_call_operand.vmem [shape: bf16[64,32], index: 1, kind: input, shape index: {}]   ;;  %s827_s2 = inlined_call_operand.vmem [shape: f32[64,1], index: 2, kind: input, shape index: {}]   ;;  %s828_s3 = inlined_call_operand.vmem [shape: bf16[64,64], index: 3, kind: input, shape index: {}]   ;;  %s829_s4 = inlined_call_operand.vmem [shape: f32[64,1], index: 4, kind: input, shape index: {}]   ;;  %s830_s5 = inlined_call_operand.vmem [shape: f32[64,1], index: 5, kind: input, shape index: {}]   ;;  %s831_s6 = inlined_call_operand.<no memory space> [shape: f32[1], index: 6, kind: input, shape index: {}]   ;;  %s832_s7 = inlined_call_operand.hbm [shape: f32[1,128], index: 7, kind: output, shape index: {}]  }
   0x1   :  { %v589_v0 = vld [vmem:[%s825_s0 + $0x38] sm:$0xff] }
   0x2   :  { %13 = vsyncpa [#allocation4], 0  ;;  %v196_v1 = vsel %vm161_vm0, %v589_v0, 0  ;;  %v59_v2 = vld [vmem:[%s827_s2 + $0x30] sm:$0xff]  ;;  %v645_v4 = vmov 0   ;;  %v57_v6 = vld [vmem:[%s827_s2 + $0x20] sm:$0xff] }
   0x3   :  { %595 = vmatpush.bf16.xpose.msra.mxu3 %v196_v1  ;;  %198 = vmatpush.bf16.xpose.msra.mxu0 %v196_v1  ;;  %v588_v3 = vld [vmem:[%s825_s0 + $0x30] sm:$0xff]  ;;  %v60_v7 = vld [vmem:[%s827_s2 + $0x38] sm:$0xff]  ;;  %v587_v8 = vld [vmem:[%s825_s0 + $0x28] sm:$0xff]  ;;  %vm331_vm9 = vcmask 523264   ;;  %s646_s29 = smov [#allocation3]  }
   0x4   :  { %594 = vmatpush.bf16.xpose.msra.mxu2 %v196_v1  ;;  %612 = vset.pattern.permute.xlu0 %v645_v4  ;;  %v193_v5 = vsel %vm161_vm0, %v588_v3, 0  ;;  %v190_v9 = vsel %vm161_vm0, %v587_v8, 0  ;;  %v58_v10 = vld [vmem:[%s827_s2 + $0x28] sm:$0xff]  ;;  %v53_v11 = vld [vmem:[%s827_s2] sm:$0xff]  ;;  %v585_v15 = vld [vmem:[%s825_s0 + $0x18] sm:$0xff]  ;;  %s494_s30 = sshll.u32 %s646_s29, 4  ;;  %s495_s30 = int_to_ptr.vmem [resolvable:$true] %s494_s30 }
   0x5   :  { %93 = vperm.xlu0 %612, %v59_v2   ;;  %613 = vset.pattern.permute.xlu1 %v645_v4  ;;  %v586_v12 = vld [vmem:[%s825_s0 + $0x20] sm:$0xff]  ;;  %v54_v14 = vld [vmem:[%s827_s2 + $0x8] sm:$0xff]  ;;  %v184_v16 = vsel %vm161_vm0, %v585_v15, 0  ;;  %v265_v18 = vld [vmem:[%s829_s4 + $0x10] sm:$0xff] }
   0x6   :  { %614 = vset.pattern.permute.xlu2 %v645_v4  ;;  %83 = vperm.xlu1 %613, %v57_v6   ;;  %v187_v13 = vsel %vm161_vm0, %v586_v12, 0  ;;  %v264_v17 = vld [vmem:[%s829_s4 + $0x8] sm:$0xff]  ;;  %v55_v19 = vld [vmem:[%s827_s2 + $0x10] sm:$0xff]  ;;  %v397_v22 = vld [vmem:[%s830_s5] sm:$0xff] }
   0x7   :  { %v584_v20 = vld [vmem:[%s825_s0 + $0x10] sm:$0xff]  ;;  %73 = vperm.xlu2 %614, %v55_v19   ;;  %v398_v23 = vld [vmem:[%s830_s5 + $0x8] sm:$0xff]  ;;  %v56_v26 = vld [vmem:[%s827_s2 + $0x18] sm:$0xff] }
   0x8   :  { %v181_v21 = vsel %vm161_vm0, %v584_v20, 0  ;;  %v583_v24 = vld [vmem:[%s825_s0 + $0x8] sm:$0xff]  ;;  %v399_v27 = vld [vmem:[%s830_s5 + $0x10] sm:$0xff]  ;;  %v582_v29 = vld [vmem:[%s825_s0] sm:$0xff] }
   0x9   :  { %v178_v25 = vsel %vm161_vm0, %v583_v24, 0  ;;  %v268_v28 = vld [vmem:[%s829_s4 + $0x28] sm:$0xff]  ;;  %v175_v30 = vsel %vm161_vm0, %v582_v29, 0  ;;  %v263_v31 = vld [vmem:[%s829_s4] sm:$0xff]  ;;  %v269_v32 = vld [vmem:[%s829_s4 + $0x30] sm:$0xff] }
   0xa   :  { %v401_v33 = vld [vmem:[%s830_s5 + $0x20] sm:$0xff]  ;;  %v580_v34 = vld [vmem:[%s826_s1 + $0x10] sm:$0xff]  ;;  %v579_v36 = vld [vmem:[%s826_s1 + $0x8] sm:$0xff] }
   0xb   :  { %597 = vmatpush.bf16.xpose.msra.mxu3 %v193_v5  ;;  %199 = vmatpush.bf16.xpose.msra.mxu0 %v193_v5  ;;  %v578_v35 = vld [vmem:[%s826_s1] sm:$0xff]  ;;  %v266_v37 = vld [vmem:[%s829_s4 + $0x18] sm:$0xff]  ;;  %v402_v38 = vld [vmem:[%s830_s5 + $0x28] sm:$0xff] }
   0xc   :  { %596 = vmatpush.bf16.xpose.msra.mxu2 %v193_v5  ;;  %v403_v39 = vld [vmem:[%s830_s5 + $0x30] sm:$0xff]  ;;  %v267_v40 = vld [vmem:[%s829_s4 + $0x20] sm:$0xff]  ;;  %v581_v41 = vld [vmem:[%s826_s1 + $0x18] sm:$0xff] }
   0xd   :  { %98 = vperm.xlu0 %612, %v60_v7   ;;  %v400_v42 = vld [vmem:[%s830_s5 + $0x18] sm:$0xff] }
   0xe   :  { %88 = vperm.xlu1 %613, %v58_v10   ;;  %v270_v43 = vld [vmem:[%s829_s4 + $0x38] sm:$0xff] }
   0xf   :  { %78 = vperm.xlu2 %614, %v56_v26   ;;  %v404_v44 = vld [vmem:[%s830_s5 + $0x38] sm:$0xff]  ;;  %v591_v26 = vld [vmem:[%s828_s3 + $0x8] sm:$0xff] }
  0x13   :  { %599 = vmatpush.bf16.xpose.msra.mxu3 %v190_v9  ;;  %200 = vmatpush.bf16.xpose.msra.mxu0 %v190_v9 }
  0x14   :  { %598 = vmatpush.bf16.xpose.msra.mxu2 %v190_v9 }
  0x15   :  { %63 = vperm.xlu0 %612, %v53_v11  }
  0x16   :  { %68 = vperm.xlu1 %613, %v54_v14  }
  0x17   :  { %273 = vperm.xlu2 %614, %v263_v31  }
  0x1b   :  { %601 = vmatpush.bf16.xpose.msra.mxu3 %v187_v13  ;;  %201 = vmatpush.bf16.xpose.msra.mxu0 %v187_v13 }
  0x1c   :  { %600 = vmatpush.bf16.xpose.msra.mxu2 %v187_v13 }
  0x1d   :  { %278 = vperm.xlu0 %612, %v264_v17  }
  0x1e   :  { %283 = vperm.xlu1 %613, %v265_v18  }
  0x1f   :  { %288 = vperm.xlu2 %614, %v266_v37  }
  0x23   :  { %603 = vmatpush.bf16.xpose.msra.mxu3 %v184_v16  ;;  %202 = vmatpush.bf16.xpose.msra.mxu0 %v184_v16 }
  0x24   :  { %602 = vmatpush.bf16.xpose.msra.mxu2 %v184_v16 }
  0x25   :  { %407 = vperm.xlu0 %612, %v397_v22  }
  0x26   :  { %412 = vperm.xlu1 %613, %v398_v23  }
  0x27   :  { %293 = vperm.xlu2 %614, %v267_v40  }
  0x2b   :  { %605 = vmatpush.bf16.xpose.msra.mxu3 %v181_v21  ;;  %203 = vmatpush.bf16.xpose.msra.mxu0 %v181_v21 }
  0x2c   :  { %604 = vmatpush.bf16.xpose.msra.mxu2 %v181_v21 }
  0x2d   :  { %417 = vperm.xlu0 %612, %v399_v27   ;;  %v592_v27 = vld [vmem:[%s828_s3 + $0x10] sm:$0xff] }
  0x2e   :  { %298 = vperm.xlu1 %613, %v268_v28   ;;  %v593_v28 = vld [vmem:[%s828_s3 + $0x18] sm:$0xff] }
  0x2f   :  { %422 = vperm.xlu2 %614, %v400_v42  }
  0x33   :  { %607 = vmatpush.bf16.xpose.msra.mxu3 %v178_v25  ;;  %204 = vmatpush.bf16.xpose.msra.mxu0 %v178_v25 }
  0x34   :  { %606 = vmatpush.bf16.xpose.msra.mxu2 %v178_v25  ;;  %v590_v25 = vld [vmem:[%s828_s3] sm:$0xff] }
  0x35   :  { %303 = vperm.xlu0 %612, %v269_v32  }
  0x36   :  { %427 = vperm.xlu1 %613, %v401_v33  }
  0x37   :  { %308 = vperm.xlu2 %614, %v270_v43  }
  0x3b   :  { %609 = vmatpush.bf16.xpose.msra.mxu3 %v175_v30  ;;  %205 = vmatpush.bf16.xpose.msra.mxu0 %v175_v30 }
  0x3c   :  { %608 = vmatpush.bf16.xpose.msra.mxu2 %v175_v30 }
  0x3d   :  { %432 = vperm.xlu0 %612, %v402_v38  }
  0x3e   :  { %437 = vperm.xlu1 %613, %v403_v39  }
  0x3f   :  { %442 = vperm.xlu2 %614, %v404_v44  }
  0x42   :  { %555 = vmatmul.msk.bf16.vlgmr.msra.gmra.mxu3 %vm161_vm0, %v580_v34  ;;  %553 = vmatmul.msk.bf16.vlgmr.msra.gmra.mxu0 %vm161_vm0, %v578_v35 }
  0x43   :  { %554 = vmatmul.msk.bf16.vlgmr.msra.gmra.mxu2 %vm161_vm0, %v579_v36 }
  0x52   :  { %556 = vmatmul.msk.bf16.gmra.mxu3 %vm161_vm0, %v581_v41 }
  0x61   :  { %v74_v50 = vpop.permute.xlu2 %73 }
  0x69   :  { %v79_v62 = vpop.permute.xlu2 %78 }
  0x71   :  { %v274_v31 = vpop.permute.xlu2 %273 }
  0x77   :  { %v94_v47 = vpop.permute.xlu0 %93 }
  0x78   :  { %v84_v48 = vpop.permute.xlu1 %83 }
  0x79   :  { %v289_v35 = vpop.permute.xlu2 %288 }
  0x7f   :  { %v99_v53 = vpop.permute.xlu0 %98 }
  0x80   :  { %v89_v54 = vpop.permute.xlu1 %88 }
  0x81   :  { %v294_v39 = vpop.permute.xlu2 %293 }
  0x87   :  { %v64_v4 = vpop.permute.xlu0 %63 }
  0x88   :  { %v69_v8 = vpop.permute.xlu1 %68 }
  0x8f   :  { %v279_v32 = vpop.permute.xlu0 %278 }
  0x90   :  { %v284_v34 = vpop.permute.xlu1 %283 }
  0x97   :  { %v408_v37 = vpop.permute.xlu0 %407 }
  0x98   :  { %v413_v38 = vpop.permute.xlu1 %412 }
  0x9f   :  { %v418_v41 = vpop.permute.xlu0 %417 }
  0xa0   :  { %v299_v42 = vpop.permute.xlu1 %298 }
  0xbf   :  { %v207_v52 = vpop.f32.mrf.mxu0 }
  0xc0   :  { %v208_v9 = vadd.f32 %v207_v52, %v64_v4 }
  0xc2   :  { %v235_v17 = vmul.f32 0.2, %v208_v9  ;;  %vm227_vm7 = vcmp.gt.f32.partialorder %v208_v9, 0.0 }
  0xc4   :  { %v243_v22 = vsel %vm227_vm7, %v208_v9, %v235_v17 }
  0xc5   :  { %v217_v45 = vpop.f32.mrf.mxu3 }
  0xc6   :  { %v212_v49 = vpop.f32.mrf.mxu2  ;;  %v218_v59 = vadd.f32 %v217_v45, %v84_v48 }
  0xc7   :  { %v213_v63 = vadd.f32 %v212_v49, %v74_v50  ;;  %v209_v3 = vpop.f32.mrf.mxu0 }
  0xc8   :  { %v239_v5 = vmul.f32 0.2, %v218_v59  ;;  %vm231_vm4 = vcmp.gt.f32.partialorder %v218_v59, 0.0  ;;  %v210_v11 = vadd.f32 %v209_v3, %v69_v8 }
  0xc9   :  { %v237_v12 = vmul.f32 0.2, %v213_v63  ;;  %vm229_vm5 = vcmp.gt.f32.partialorder %v213_v63, 0.0 }
  0xca   :  { %v247_v15 = vsel %vm231_vm4, %v218_v59, %v239_v5  ;;  %v236_v18 = vmul.f32 0.2, %v210_v11  ;;  %vm228_vm8 = vcmp.gt.f32.partialorder %v210_v11, 0.0 }
  0xcb   :  { %v245_v19 = vsel %vm229_vm5, %v213_v63, %v237_v12 }
  0xcc   :  { %v244_v23 = vsel %vm228_vm8, %v210_v11, %v236_v18 }
  0xcd   :  { %v219_v46 = vpop.f32.mrf.mxu3  ;;  %v259_v24 = vpack.c.bf16 %v244_v23, %v243_v22 }
  0xce   :  { %v220_v56 = vadd.f32 %v219_v46, %v89_v54  ;;  %v214_v57 = vpop.f32.mrf.mxu2 }
  0xcf   :  { %v215_v1 = vadd.f32 %v214_v57, %v79_v62  ;;  %v428_v57 = vpop.permute.xlu1 %427 }
  0xd0   :  { %v240_v0 = vmul.f32 0.2, %v220_v56  ;;  %vm232_vm3 = vcmp.gt.f32.partialorder %v220_v56, 0.0 }
  0xd1   :  { %v238_v13 = vmul.f32 0.2, %v215_v1  ;;  %vm230_vm6 = vcmp.gt.f32.partialorder %v215_v1, 0.0 }
  0xd2   :  { %v248_v14 = vsel %vm232_vm3, %v220_v56, %v240_v0 }
  0xd3   :  { %v261_v16 = vpack.c.bf16 %v248_v14, %v247_v15  ;;  %v246_v20 = vsel %vm230_vm6, %v215_v1, %v238_v13 }
  0xd4   :  { %v260_v21 = vpack.c.bf16 %v246_v20, %v245_v19 }
  0xd5   :  { %v222_v51 = vpop.f32.mrf.mxu3 }
  0xd6   :  { %v223_v55 = vadd.f32 %v222_v51, %v94_v47  ;;  %v423_v47 = vpop.permute.xlu2 %422 }
  0xd7   :  { %v438_v17 = vpop.permute.xlu1 %437 }
  0xd8   :  { %v241_v60 = vmul.f32 0.2, %v223_v55  ;;  %vm233_vm1 = vcmp.gt.f32.partialorder %v223_v55, 0.0 }
  0xda   :  { %v249_v6 = vsel %vm233_vm1, %v223_v55, %v241_v60 }
  0xdd   :  { %v224_v58 = vpop.f32.mrf.mxu3 }
  0xde   :  { %v225_v61 = vadd.f32 %v224_v58, %v99_v53  ;;  %v304_v53 = vpop.permute.xlu0 %303  ;;  %v309_v4 = vpop.permute.xlu2 %308 }
  0xe0   :  { %v242_v2 = vmul.f32 0.2, %v225_v61  ;;  %vm234_vm2 = vcmp.gt.f32.partialorder %v225_v61, 0.0 }
  0xe2   :  { %v250_v7 = vsel %vm234_vm2, %v225_v61, %v242_v2 }
  0xe3   :  { %v262_v10 = vpack.c.bf16 %v250_v7, %v249_v6 }
  0xe5   :  { %348 = vmatpush.bf16.msra.mxu1 %v262_v10 }
  0xe6   :  { %v433_v12 = vpop.permute.xlu0 %432  ;;  %v443_v23 = vpop.permute.xlu2 %442 }
  0xe9   :  { %349 = vmatpush.bf16.msra.mxu1 %v261_v16 }
  0xed   :  { %350 = vmatpush.bf16.msra.mxu1 %v260_v21 }
  0xf1   :  { %351 = vmatpush.bf16.msra.mxu1 %v259_v24 }
  0xf4   :  { %573 = vmatmul.msk.bf16.vlgmr.msra.gmra.mxu1 %vm331_vm9, %v590_v25 }
 0x104   :  { %574 = vmatmul.msk.bf16.gmra.mxu1 %vm331_vm9, %v591_v26 }
 0x114   :  { %575 = vmatmul.msk.bf16.gmra.mxu1 %vm331_vm9, %v592_v27 }
 0x124   :  { %576 = vmatmul.msk.bf16.gmra.mxu1 %vm331_vm9, %v593_v28 }
 0x171   :  { %v353_v29 = vpop.f32.mrf.mxu1 }
 0x172   :  { %v354_v44 = vadd.f32 %v353_v29, %v274_v31 }
 0x174   :  { %v381_v50 = vmul.f32 0.2, %v354_v44  ;;  %vm373_vm11 = vcmp.gt.f32.partialorder %v354_v44, 0.0 }
 0x176   :  { %v389_v58 = vsel %vm373_vm11, %v354_v44, %v381_v50 }
 0x177   :  { %v445_v2 = vmul.f32 %v408_v37, %v389_v58 }
 0x179   :  { %v355_v30 = vpop.f32.mrf.mxu1 }
 0x17a   :  { %v356_v43 = vadd.f32 %v355_v30, %v279_v32 }
 0x17c   :  { %v382_v48 = vmul.f32 0.2, %v356_v43  ;;  %vm374_vm10 = vcmp.gt.f32.partialorder %v356_v43, 0.0 }
 0x17e   :  { %v390_v54 = vsel %vm374_vm10, %v356_v43, %v382_v48 }
 0x17f   :  { %v446_v61 = vmul.f32 %v413_v38, %v390_v54 }
 0x181   :  { %v358_v33 = vpop.f32.mrf.mxu1  ;;  %v453_v7 = vadd.f32 %v446_v61, %v445_v2 }
 0x182   :  { %v359_v45 = vadd.f32 %v358_v33, %v284_v34  ;;  %v467_v33 = vstv %s831_s6  ;;  %s496_s6 = sshll.u32 %s832_s7, 4  ;;  %s497_s6 = int_to_ptr.hbm [resolvable:$true] %s496_s6 }
 0x184   :  { %v383_v51 = vmul.f32 0.2, %v359_v45  ;;  %vm375_vm12 = vcmp.gt.f32.partialorder %v359_v45, 0.0 }
 0x186   :  { %v391_v59 = vsel %vm375_vm12, %v359_v45, %v383_v51 }
 0x187   :  { %v447_v3 = vmul.f32 %v418_v41, %v391_v59 }
 0x189   :  { %v360_v36 = vpop.f32.mrf.mxu1  ;;  %v454_v10 = vadd.f32 %v453_v7, %v447_v3 }
 0x18a   :  { %v361_v49 = vadd.f32 %v360_v36, %v289_v35 }
 0x18c   :  { %v384_v55 = vmul.f32 0.2, %v361_v49  ;;  %vm376_vm13 = vcmp.gt.f32.partialorder %v361_v49, 0.0 }
 0x18e   :  { %v392_v63 = vsel %vm376_vm13, %v361_v49, %v384_v55 }
 0x18f   :  { %v448_v8 = vmul.f32 %v423_v47, %v392_v63 }
 0x191   :  { %v363_v40 = vpop.f32.mrf.mxu1  ;;  %v455_v14 = vadd.f32 %v454_v10, %v448_v8 }
 0x192   :  { %v364_v52 = vadd.f32 %v363_v40, %v294_v39 }
 0x194   :  { %v385_v60 = vmul.f32 0.2, %v364_v52  ;;  %vm377_vm14 = vcmp.gt.f32.partialorder %v364_v52, 0.0 }
 0x196   :  { %v393_v5 = vsel %vm377_vm14, %v364_v52, %v385_v60 }
 0x197   :  { %v449_v11 = vmul.f32 %v428_v57, %v393_v5 }
 0x199   :  { %v365_v46 = vpop.f32.mrf.mxu1  ;;  %v456_v19 = vadd.f32 %v455_v14, %v449_v11 }
 0x19a   :  { %v366_v56 = vadd.f32 %v365_v46, %v299_v42 }
 0x19c   :  { %v386_v0 = vmul.f32 0.2, %v366_v56  ;;  %vm378_vm15 = vcmp.gt.f32.partialorder %v366_v56, 0.0 }
 0x19e   :  { %v394_v9 = vsel %vm378_vm15, %v366_v56, %v386_v0 }
 0x19f   :  { %v450_v15 = vmul.f32 %v433_v12, %v394_v9 }
 0x1a1   :  { %v368_v62 = vpop.f32.mrf.mxu1  ;;  %v457_v22 = vadd.f32 %v456_v19, %v450_v15 }
 0x1a2   :  { %v369_v1 = vadd.f32 %v368_v62, %v304_v53 }
 0x1a4   :  { %v387_v6 = vmul.f32 0.2, %v369_v1  ;;  %vm379_vm0 = vcmp.gt.f32.partialorder %v369_v1, 0.0 }
 0x1a6   :  { %v395_v13 = vsel %vm379_vm0, %v369_v1, %v387_v6 }
 0x1a7   :  { %v451_v20 = vmul.f32 %v438_v17, %v395_v13 }
 0x1a9   :  { %v370_v16 = vpop.f32.mrf.mxu1  ;;  %v458_v25 = vadd.f32 %v457_v22, %v451_v20 }
 0x1aa   :  { %v371_v18 = vadd.f32 %v370_v16, %v309_v4 }
 0x1ac   :  { %vm380_vm1 = vcmp.gt.f32.partialorder %v371_v18, 0.0  ;;  %v388_v21 = vmul.f32 0.2, %v371_v18 }
 0x1ae   :  { %v396_v24 = vsel %vm380_vm1, %v371_v18, %v388_v21 }
 0x1af   :  { %v452_v26 = vmul.f32 %v443_v23, %v396_v24 }
 0x1b1   :  { %v459_v27 = vadd.f32 %v458_v25, %v452_v26 }
 0x1b3   :  { %v460_v28 = vrot.slane %v459_v27, 4 }
 0x1b5   :  { %v461_v29 = vadd.f32 %v460_v28, %v459_v27 }
 0x1b7   :  { %v462_v30 = vrot.slane %v461_v29, 2 }
 0x1b9   :  { %v463_v31 = vadd.f32 %v462_v30, %v461_v29 }
 0x1bb   :  { %v464_v32 = vrot.slane %v463_v31, 1 }
 0x1bd   :  { %v465_v34 = vadd.f32 %v464_v32, %v463_v31 }
 0x1bf   :  { %v468_v35 = vadd.f32 %v467_v33, %v465_v34 }
 0x1c1   :  { %v577_v36 = vmul.f32 -1.442695, %v468_v35 }
 0x1c3   :  { %615 = vpow2.f32 %v577_v36 }
 0x1c9   :  { %v616_v37 = vpop.eup %615 }
 0x1ca   :  { %v472_v38 = vadd.f32 1.0, %v616_v37 }
 0x1cc   :  { %617 = vrcp.f32 %v472_v38  ;;  %v484_v42 = vand.u32 2147483648, %v472_v38  ;;  %v482_v44 = vand.u32 2147483647, %v472_v38  ;;  %vm478_vm3 = vweird.f32 %v472_v38 }
 0x1ce   :  { %v485_v46 = vor.u32 1.1754944e-38, %v484_v42  ;;  %vm483_vm5 = vcmp.eq.f32.partialorder %v482_v44, 8.507059e+37 }
 0x1d2   :  { %v618_v39 = vpop.eup %617 }
 0x1d3   :  { %v474_v40 = vmul.f32 %v618_v39, %v472_v38  ;;  %vm479_vm2 = vweird.f32 %v618_v39 }
 0x1d4   :  { %vm480_vm4 = vmor %vm478_vm3, %vm479_vm2 }
 0x1d5   :  { %v475_v41 = vsub.f32 1.0, %v474_v40 }
 0x1d7   :  { %v476_v43 = vmul.f32 %v618_v39, %v475_v41 }
 0x1d9   :  { %v477_v45 = vadd.f32 %v618_v39, %v476_v43 }
 0x1db   :  { %v481_v47 = vsel %vm480_vm4, %v618_v39, %v477_v45 }
 0x1dc   :  { %v486_v48 = vsel %vm483_vm5, %v485_v46, %v481_v47 }
 0x1dd   :  { %488 = vst [vmem:[#allocation3] sm:$0x1] %v486_v48 }
 0x1de   :  { %499 = dma.vmem_to_hbm [thread:$0]  %s495_s30, 16, %s497_s6, [#allocation4]  }
 0x1df   :  { %643 = dma.done.wait [#allocation4], 16  }
 0x1e0   :  { %644 = vsyncadd [#allocation4], 4294967280 }
 0x1e1   :  { %504 = vsyncpa [#allocation4], 1 }

</bundles_post_ra>
